<compile_context>
chip_gen: v7x
topology: tpu7x:2x2x1
jax: 0.10.0
libtpu: 0.0.40
codegen_flags: <defaults>
</compile_context>

<pallas_src>
import functools

import jax
import jax.numpy as jnp
from jax.experimental import pallas as pl
from jax.experimental.pallas import tpu as pltpu


def _cdiv(a, b):
    return -(-a // b)


def _round_up(x, m):
    return _cdiv(x, m) * m


_LANE = 128
_SUBLANE = 8
_MAX_TILE_N = 8192     # per-step overhead (~0.35 us) is fully amortized here
_MIN_SPLIT = 1024      # single-tile cases >= 2*_MIN_SPLIT rows are split into
                       # >=2 "parallel" steps so both v7x TensorCores are used


def _tpu_vmem_bytes():
    """Physical VMEM per core; conservative 64 MiB (v7x) fallback."""
    try:
        info = pltpu.get_tpu_info()
        v = int(getattr(info, "vmem_capacity_bytes", 0) or 0)
        if v > 0:
            return min(max(v, 32 * 1024 * 1024), 256 * 1024 * 1024)
    except Exception:
        pass
    return 64 * 1024 * 1024


def _pick_tile_n(n_rows, d, dp, budget):
    """Largest row tile whose working set fits `budget`, balanced across grid
    steps, (8,128)-friendly, and never larger than the array itself."""
    # Grid-invariant operands (W1a, W1b bf16; b1 f32; w2 bf16; b2), x2 buffers.
    weight_bytes = 2 * (2 * d * dp * 2 + dp * 4 + dp * 2 + 4)
    avail = max(budget - weight_bytes, 1 << 20)
    # Per row: src+dst f32 blocks (double-buffered) + in-kernel bf16 copies
    # + f32/bf16 hidden activations + the f32 output row (double-buffered).
    per_row = 2 * (2 * d * 4) + 2 * d * 2 + dp * 4 + dp * 2 + 2 * 4
    cap = min(avail // per_row, _MAX_TILE_N)
    cap = max(_LANE, (cap // _LANE) * _LANE)

    if n_rows <= cap:
        if n_rows >= 2 * _MIN_SPLIT:
            # Big enough to split: >=2 grid steps keep both v7x TCs busy
            # (harmless on 1-TC v5e/v6e at these sizes).
            return _round_up(_cdiv(n_rows, 2), _LANE)
        return n_rows                      # single full-array block (any size)
    steps = _cdiv(n_rows, cap)
    return min(cap, _round_up(_cdiv(n_rows, steps), _LANE))


def mlp_predictor_kernel(src_ref, dst_ref, w1a_ref, w1b_ref, b1_ref,
                         w2_ref, b2_ref, o_ref):
    # ---- layer 1: (virtual) concat -> two MXU matmuls, f32 accumulation ----
    # In-kernel bf16 cast (VPU): MXU is bf16-native, kernel is mem-bound, so
    # the cast is free and the f32 HBM stream stays at native width.
    src_bf = src_ref[...].astype(jnp.bfloat16)             # (tile_n, D)
    dst_bf = dst_ref[...].astype(jnp.bfloat16)
    h = (jnp.dot(src_bf, w1a_ref[...], preferred_element_type=jnp.float32)
         + jnp.dot(dst_bf, w1b_ref[...], preferred_element_type=jnp.float32)
         + b1_ref[...])                                     # (tile_n, Dp) f32
    h = jnp.maximum(h, 0.0)                                 # ReLU (VPU)

    # ---- layer 2: Dp -> 1 as a second MXU contraction ----------------------
    # w2 (1, Dp) . h (tile_n, Dp) over Dp -> (1, tile_n): lane-dense output
    # row straight from the MXU; no XLU transpose / VPU reduce epilogue.
    logits = jax.lax.dot_general(
        w2_ref[...], h.astype(jnp.bfloat16),
        (((1,), (1,)), ((), ())),
        preferred_element_type=jnp.float32)                 # (1, tile_n) f32
    logits = logits + b2_ref[...]                           # f32 (v5e-safe)

    # ---- sigmoid (EUP) + lane-dense store ----------------------------------
    o_ref[...] = jax.nn.sigmoid(logits).astype(o_ref.dtype)


def mlp_predictor(src, dst, w1, b1, w2, b2, *, tile_n=None):
    """src, dst: (N, D); w1: (D, 2D) (torch (out, in) layout); b1: (D,);
       w2: (1, D); b2: (1,). Returns sigmoid(relu([src|dst] @ w1.T + b1) @ w2.T + b2)
       as an (N, 1) float32 array."""
    N, D = src.shape
    assert N >= 1
    assert dst.shape == (N, D)
    assert w1.shape == (D, 2 * D) and b1.shape == (D,)
    assert w2.shape == (1, D) and b2.shape == (1,)

    Dp = _round_up(D, _LANE)               # layer-1 OUTPUT dim padded to lanes
    vmem_phys = _tpu_vmem_bytes()
    budget = (vmem_phys * 3) // 8          # working-set budget (double-buffered)
    vmem_limit = vmem_phys // 2            # 32 MiB on v7x, 64 MiB on v5e/v6e

    if tile_n is None:
        tile_n = _pick_tile_n(N, D, Dp, budget)
    else:
        tile_n = max(_SUBLANE, (int(tile_n) // _SUBLANE) * _SUBLANE)
        if tile_n >= N:
            tile_n = N                     # single full-array block
    num_tiles = _cdiv(N, tile_n)
    L = num_tiles * tile_n                 # lane-dense output row length (>= N)

    def pad2(x, rows, cols, dtype):
        x = x.astype(dtype)
        return jnp.pad(x, ((0, rows - x.shape[0]), (0, cols - x.shape[1])))

    # Tiny grid-invariant operands only: bf16 for the MXU, zero-padded output
    # columns are exact (padded h columns are relu(0)=0, padded w2 entries 0).
    w1a = pad2(w1[:, :D].T, D, Dp, jnp.bfloat16)     # (D, Dp), src half of W1.T
    w1b = pad2(w1[:, D:].T, D, Dp, jnp.bfloat16)     # (D, Dp), dst half of W1.T
    b1_p = pad2(b1.reshape(1, D), 1, Dp, jnp.float32)
    w2_p = pad2(w2, 1, Dp, jnp.bfloat16)
    b2_p = b2.reshape(1, 1).astype(jnp.float32)

    rows = num_tiles * tile_n
    cost = pl.CostEstimate(
        flops=2 * rows * (2 * D) * Dp + 2 * rows * Dp,
        transcendentals=rows,                         # sigmoid
        bytes_accessed=(2 * N * D * 4                 # src + dst (f32, native)
                        + 2 * D * Dp * 2              # W1a + W1b (bf16)
                        + Dp * 4 + Dp * 2 + 4         # b1, w2, b2
                        + L * 4))                     # output row (f32)

    out = pl.pallas_call(
        mlp_predictor_kernel,
        out_shape=jax.ShapeDtypeStruct((1, L), jnp.float32),
        grid=(num_tiles,),
        in_specs=[
            pl.BlockSpec((tile_n, D), lambda i: (i, 0)),   # src rows (native D)
            pl.BlockSpec((tile_n, D), lambda i: (i, 0)),   # dst rows (native D)
            pl.BlockSpec((D, Dp), lambda i: (0, 0)),       # W1a (grid-invariant)
            pl.BlockSpec((D, Dp), lambda i: (0, 0)),       # W1b (grid-invariant)
            pl.BlockSpec((1, Dp), lambda i: (0, 0)),       # b1
            pl.BlockSpec((1, Dp), lambda i: (0, 0)),       # w2 row
            pl.BlockSpec((1, 1), lambda i: (0, 0)),        # b2
        ],
        out_specs=pl.BlockSpec((1, tile_n), lambda i: (0, i)),  # lane-dense row
        compiler_params=pltpu.CompilerParams(
            dimension_semantics=("parallel",),
            vmem_limit_bytes=vmem_limit),
        cost_estimate=cost,
    )(src, dst, w1a, w1b, b1_p, w2_p, b2_p)

    # (1, L) lane-dense row -> (N, 1); garbage from ragged trailing lanes is
    # sliced off here.
    return out.reshape(L, 1)[:N]


def _torch_linear_init(key, out_features, in_features):
    """Deterministic init matching nn.Linear defaults:
    W, b ~ U(-1/sqrt(fan_in), 1/sqrt(fan_in))."""
    kw, kb = jax.random.split(key)
    bound = 1.0 / jnp.sqrt(jnp.float32(in_features))
    w = jax.random.uniform(kw, (out_features, in_features), jnp.float32,
                           minval=-bound, maxval=bound)
    b = jax.random.uniform(kb, (out_features,), jnp.float32,
                           minval=-bound, maxval=bound)
    return w, b


def _reference(src, dst, w1, b1, w2, b2):
    x = jnp.concatenate([src, dst], axis=1)
    return jax.nn.sigmoid(jnp.maximum(x @ w1.T + b1, 0.0) @ w2.T + b2)


def _run_case(key, N, D, atol, tile_n=None):
    k_src, k_dst, k_l1, k_l2 = jax.random.split(key, 4)
    src = jax.random.normal(k_src, (N, D), jnp.float32)
    dst = jax.random.normal(k_dst, (N, D), jnp.float32)
    w1, b1 = _torch_linear_init(k_l1, D, 2 * D)
    w2, b2 = _torch_linear_init(k_l2, 1, D)

    fn = mlp_predictor if tile_n is None else functools.partial(
        mlp_predictor, tile_n=tile_n)
    out = jax.jit(fn)(src, dst, w1, b1, w2, b2)
    out = jax.block_until_ready(out)

    ref = _reference(src, dst, w1, b1, w2, b2)
    assert out.shape == (N, 1)
    err = float(jnp.max(jnp.abs(out - ref)))
    # bf16 weights/activations on both matmuls -> relaxed tolerance vs f32 ref.
    assert err < atol, f"N={N} D={D}: max abs err {err}"
    return err


if __name__ == "__main__":
    key = jax.random.PRNGKey(0)
    k1, k2, k3 = jax.random.split(key, 3)
    # Small shapes consistent with the module: batch of node pairs, embedding_dim.
    _run_case(k1, N=8, D=32, atol=2e-2)
    # Non-aligned N and D exercise the full-array (masked) block path, no padding.
    _run_case(k2, N=37, D=48, atol=2e-2)
    # Forced small tile exercises the multi-step grid + ragged last input block.
    _run_case(k3, N=300, D=32, atol=2e-2, tile_n=128)
    print("KERNEL_OK")
</pallas_src>

<mosaic_0001>
module attributes {stable_mosaic.version = 11 : i64} {
  func.func @mlp_predictor_kernel(%arg0: i32, %arg1: memref<8x32xf32, #tpu.memory_space<vmem>>, %arg2: memref<8x32xf32, #tpu.memory_space<vmem>>, %arg3: memref<32x128xbf16, #tpu.memory_space<vmem>>, %arg4: memref<32x128xbf16, #tpu.memory_space<vmem>>, %arg5: memref<1x128xf32, #tpu.memory_space<vmem>>, %arg6: memref<1x128xbf16, #tpu.memory_space<vmem>>, %arg7: memref<1x1xf32, #tpu.memory_space<vmem>>, %arg8: memref<1x8xf32, #tpu.memory_space<vmem>>) attributes {dimension_semantics = [#tpu.dimension_semantics<parallel>], iteration_bounds = array<i64: 1>, scalar_prefetch = 0 : i64, scratch_operands = 0 : i64, tpu.core_type = #tpu.core_type<tc>, window_params = [{transform_indices = @transform_0, window_bounds = array<i64: 8, 32>}, {transform_indices = @transform_1, window_bounds = array<i64: 8, 32>}, {pipeline_mode = #tpu.pipeline_mode<synchronous>, transform_indices = @transform_2, window_bounds = array<i64: 32, 128>}, {pipeline_mode = #tpu.pipeline_mode<synchronous>, transform_indices = @transform_3, window_bounds = array<i64: 32, 128>}, {pipeline_mode = #tpu.pipeline_mode<synchronous>, transform_indices = @transform_4, window_bounds = array<i64: 1, 128>}, {pipeline_mode = #tpu.pipeline_mode<synchronous>, transform_indices = @transform_5, window_bounds = array<i64: 1, 128>}, {pipeline_mode = #tpu.pipeline_mode<synchronous>, transform_indices = @transform_6, window_bounds = array<i64: 1, 1>}, {transform_indices = @transform_7, window_bounds = array<i64: 1, 8>}]} {
    %c0 = arith.constant 0 : index
    %c0_0 = arith.constant 0 : index
    %0 = vector.load %arg1[%c0, %c0_0] : memref<8x32xf32, #tpu.memory_space<vmem>>, vector<8x32xf32>
    %1 = arith.truncf %0 : vector<8x32xf32> to vector<8x32xbf16>
    %c0_1 = arith.constant 0 : index
    %c0_2 = arith.constant 0 : index
    %2 = vector.load %arg2[%c0_1, %c0_2] : memref<8x32xf32, #tpu.memory_space<vmem>>, vector<8x32xf32>
    %3 = arith.truncf %2 : vector<8x32xf32> to vector<8x32xbf16>
    %c0_3 = arith.constant 0 : index
    %c0_4 = arith.constant 0 : index
    %4 = vector.load %arg3[%c0_3, %c0_4] : memref<32x128xbf16, #tpu.memory_space<vmem>>, vector<32x128xbf16>
    %cst = arith.constant dense<0.000000e+00> : vector<8x128xf32>
    %5 = tpu.matmul %1, %4, %cst {dimension_numbers = #tpu.dot_dimension_numbers<[1], [0], [0], [1], [0, 0, 1, 1], [], []>} : vector<8x32xbf16>, vector<32x128xbf16>, vector<8x128xf32> -> vector<8x128xf32>
    %c0_5 = arith.constant 0 : index
    %c0_6 = arith.constant 0 : index
    %6 = vector.load %arg4[%c0_5, %c0_6] : memref<32x128xbf16, #tpu.memory_space<vmem>>, vector<32x128xbf16>
    %cst_7 = arith.constant dense<0.000000e+00> : vector<8x128xf32>
    %7 = tpu.matmul %3, %6, %cst_7 {dimension_numbers = #tpu.dot_dimension_numbers<[1], [0], [0], [1], [0, 0, 1, 1], [], []>} : vector<8x32xbf16>, vector<32x128xbf16>, vector<8x128xf32> -> vector<8x128xf32>
    %8 = arith.addf %5, %7 : vector<8x128xf32>
    %c0_8 = arith.constant 0 : index
    %c0_9 = arith.constant 0 : index
    %9 = vector.load %arg5[%c0_8, %c0_9] : memref<1x128xf32, #tpu.memory_space<vmem>>, vector<1x128xf32>
    %10 = vector.broadcast %9 : vector<1x128xf32> to vector<8x128xf32>
    %11 = arith.addf %8, %10 : vector<8x128xf32>
    %cst_10 = arith.constant 0.000000e+00 : f32
    %12 = vector.broadcast %cst_10 : f32 to vector<8x128xf32>
    %13 = arith.maximumf %11, %12 : vector<8x128xf32>
    %c0_11 = arith.constant 0 : index
    %c0_12 = arith.constant 0 : index
    %14 = vector.load %arg6[%c0_11, %c0_12] : memref<1x128xbf16, #tpu.memory_space<vmem>>, vector<1x128xbf16>
    %15 = arith.truncf %13 : vector<8x128xf32> to vector<8x128xbf16>
    %cst_13 = arith.constant dense<0.000000e+00> : vector<1x8xf32>
    %16 = tpu.matmul %14, %15, %cst_13 {dimension_numbers = #tpu.dot_dimension_numbers<[1], [1], [0], [0], [0, 0, 1, 0], [], []>} : vector<1x128xbf16>, vector<8x128xbf16>, vector<1x8xf32> -> vector<1x8xf32>
    %c0_14 = arith.constant 0 : index
    %c0_15 = arith.constant 0 : index
    %17 = vector.load %arg7[%c0_14, %c0_15] : memref<1x1xf32, #tpu.memory_space<vmem>>, vector<1x1xf32>
    %18 = vector.broadcast %17 : vector<1x1xf32> to vector<1x8xf32>
    %19 = arith.addf %16, %18 : vector<1x8xf32>
    %20 = arith.negf %19 : vector<1x8xf32>
    %21 = math.exp %20 : vector<1x8xf32>
    %cst_16 = arith.constant 1.000000e+00 : f32
    %22 = vector.broadcast %cst_16 : f32 to vector<1x8xf32>
    %23 = arith.addf %22, %21 : vector<1x8xf32>
    %24 = arith.divf %22, %23 : vector<1x8xf32>
    %c0_17 = arith.constant 0 : index
    %c0_18 = arith.constant 0 : index
    %25 = vector.load %arg8[%c0_17, %c0_18] : memref<1x8xf32, #tpu.memory_space<vmem>>, vector<1x8xf32>
    tpu.vector_store %arg8[%c0_17, %c0_18], %24 {strides = array<i32>} : memref<1x8xf32, #tpu.memory_space<vmem>>, vector<1x8xf32>,
    return
  }
  func.func @transform_0(%arg0: i32) -> (i32, i32) {
    %c0_i32 = arith.constant 0 : i32
    %c0_i32_0 = arith.constant 0 : i32
    return %arg0, %c0_i32 : i32, i32
  }
  func.func @transform_1(%arg0: i32) -> (i32, i32) {
    %c0_i32 = arith.constant 0 : i32
    %c0_i32_0 = arith.constant 0 : i32
    return %arg0, %c0_i32 : i32, i32
  }
  func.func @transform_2(%arg0: i32) -> (i32, i32) {
    %c0_i32 = arith.constant 0 : i32
    %c0_i32_0 = arith.constant 0 : i32
    %c0_i32_1 = arith.constant 0 : i32
    return %c0_i32, %c0_i32_0 : i32, i32
  }
  func.func @transform_3(%arg0: i32) -> (i32, i32) {
    %c0_i32 = arith.constant 0 : i32
    %c0_i32_0 = arith.constant 0 : i32
    %c0_i32_1 = arith.constant 0 : i32
    return %c0_i32, %c0_i32_0 : i32, i32
  }
  func.func @transform_4(%arg0: i32) -> (i32, i32) {
    %c0_i32 = arith.constant 0 : i32
    %c0_i32_0 = arith.constant 0 : i32
    %c0_i32_1 = arith.constant 0 : i32
    return %c0_i32, %c0_i32_0 : i32, i32
  }
  func.func @transform_5(%arg0: i32) -> (i32, i32) {
    %c0_i32 = arith.constant 0 : i32
    %c0_i32_0 = arith.constant 0 : i32
    %c0_i32_1 = arith.constant 0 : i32
    return %c0_i32, %c0_i32_0 : i32, i32
  }
  func.func @transform_6(%arg0: i32) -> (i32, i32) {
    %c0_i32 = arith.constant 0 : i32
    %c0_i32_0 = arith.constant 0 : i32
    %c0_i32_1 = arith.constant 0 : i32
    return %c0_i32, %c0_i32_0 : i32, i32
  }
  func.func @transform_7(%arg0: i32) -> (i32, i32) {
    %c0_i32 = arith.constant 0 : i32
    %c0_i32_0 = arith.constant 0 : i32
    return %c0_i32, %arg0 : i32, i32
  }
}

</mosaic_0001>

<bundles_post_ra>
// kernel: mlp_predictor.1
= control target key start
LH: loop header
LB: loop body
LE: loop exit
PB: predicated region body
PF: predicated region fallthrough
CT: control target
= control target key end

     0   :  { %s397_s0 = inlined_call_operand.vmem [shape: f32[8,32], index: 0, kind: input, shape index: {}]   ;;  %s398_s1 = inlined_call_operand.vmem [shape: f32[8,32], index: 1, kind: input, shape index: {}]   ;;  %s399_s2 = inlined_call_operand.vmem [shape: bf16[32,128], index: 2, kind: input, shape index: {}]   ;;  %s400_s3 = inlined_call_operand.vmem [shape: bf16[32,128], index: 3, kind: input, shape index: {}]   ;;  %s401_s4 = inlined_call_operand.vmem [shape: f32[1,128], index: 4, kind: input, shape index: {}]   ;;  %s402_s5 = inlined_call_operand.vmem [shape: bf16[1,128], index: 5, kind: input, shape index: {}]   ;;  %s403_s6 = inlined_call_operand.<no memory space> [shape: f32[1,1], index: 6, kind: input, shape index: {}]   ;;  %s404_s7 = inlined_call_operand.hbm [shape: f32[1,8], index: 7, kind: output, shape index: {}]  }
   0x1   :  { %v12_v0 = vstv %s403_s6 }
   0x2   :  { %13 = vst [vmem:[#allocation2] sm:$0x1] %v12_v0 }
   0x3   :  { %v279_v1 = vld [vmem:[%s400_s3] sm:$0xff]   ;;  %v311_v2 = vmov 0.0   ;;  %v281_v4 = vld [vmem:[%s400_s3 + $0x8] sm:$0xff]   ;;  %vm312_vm0 = vmmov 0  }
   0x4   :  { %252 = vmatprep.subr.bf16.mxu0 %v311_v2  ;;  %260 = vmatprep.subr.bf16.mxu1 %v311_v2  ;;  %v280_v3 = vld [vmem:[%s399_s2] sm:$0xff]   ;;  %v282_v5 = vld [vmem:[%s399_s2 + $0x8] sm:$0xff]  }
   0x5   :  { %253 = vmatpush3.bf16.msra.mxu0 %v279_v1  ;;  %256 = vmatprep.mubr.msk.bf16.mxu0 %vm312_vm0, %v311_v2  ;;  %v32_v6 = vld [vmem:[%s398_s1] sm:$0xff] }
   0x6   :  { %261 = vmatpush3.bf16.msra.mxu1 %v280_v3  ;;  %254 = vmatprep.subr.bf16.mxu0 %v311_v2  ;;  %v30_v7 = vld [vmem:[%s397_s0] sm:$0xff] }
   0x7   :  { %262 = vmatprep.subr.bf16.mxu1 %v311_v2  ;;  %264 = vmatprep.mubr.msk.bf16.mxu1 %vm312_vm0, %v311_v2 }
   0x8   :  { %14 = vsyncpa [#allocation4], 0  ;;  %v33_v8 = vpack.c.bf16 %v32_v6, %v32_v6  ;;  %vm54_vm1 = vcmask 261120   ;;  %v31_v9 = vpack.c.bf16 %v30_v7, %v30_v7  ;;  %v313_v11 = vmov 0   ;;  %v242_v14 = vld [vmem:[%s401_s4] ss:$0 sm:$0xff] }
   0x9   :  { %255 = vmatpush3.bf16.msra.mxu0 %v281_v4  ;;  %v164_v10 = vld [vmem:[#allocation2] sm:$0x1]  ;;  %278 = vset.pattern.permute.xlu0 %v313_v11  ;;  %v170_v26 = vlaneseq  ;;  %s314_s4 = smov [#allocation3]   ;;  %vm220_vm2 = vcmask 57344  }
   0xa   :  { %263 = vmatpush3.bf16.msra.mxu1 %v282_v5  ;;  %268 = vmatprep.subr.bf16.mxu0 %v311_v2  ;;  %v162_v25 = vld [vmem:[%s402_s5] sm:$0x1]  ;;  %s228_s14 = sshll.u32 %s314_s4, 4  ;;  %s229_s14 = int_to_ptr.vmem [resolvable:$true] %s228_s14 }
   0xb   :  { %167 = vperm.xlu0 %278, %v164_v10   ;;  %v171_v27 = vshrl.u32 %v170_v26, 7  ;;  %s287_s5 = scalar_lea.vmem %s229_s14, 16  ;;  %s291_s15 = scalar_lea.vmem %s229_s14, 32 }
   0xc   :  { %257 = vmatmul.mubr.msk.bf16.vlgmr.msra.gmra.mrb[0].mxu0 %vm54_vm1, %v33_v8  ;;  %p288_p0 = scmp.ne.s32.totalorder %s229_s14, %s287_s5  ;;  %p292_p1 = scmp.lt.s32.totalorder %s229_s14, %s229_s14 }
   0xd   :  { %265 = vmatmul.mubr.msk.bf16.vlgmr.msra.gmra.mrb[0].mxu1 %vm54_vm1, %v31_v9  ;;  %270 = vmatprep.mubr.msk.bf16.mxu0 %vm312_vm0, %v311_v2  ;;  %v172_v28 = vsub.s32 0, %v171_v27  ;;  %p293_p2 = scmp.lt.s32.totalorder %s291_s15, %s287_s5 }
   0xf   :  { %p294_p3 = por %p293_p2, %p292_p1 }
  0x11   :  { %p295_p4 = pnand %p294_p3, %p288_p0 }
  0x8a   :  { %v168_v29 = vpop.permute.xlu0 %167 }
  0x8b   :  { %v173_v30 = vrot.slane %v168_v29, %v172_v28 }
  0xdf   :  { %v92_v12 = vpop.f32.mrb[0].mxu0 }
  0xe0   :  { %v147_v13 = vpop.f32.mrb[0].mxu1  ;;  %v258_v15 = vpop.f32.mrb[1].mxu0 }
  0xe1   :  { %v148_v16 = vadd.f32 %v147_v13, %v92_v12  ;;  %v266_v17 = vpop.f32.mrb[1].mxu1  ;;  %v95_v18 = vpop.f32.mrb[2].mxu0 }
  0xe2   :  { %v150_v19 = vpop.f32.mrb[2].mxu1  ;;  %v259_v20 = vpop.f32.mrb[3].mxu0 }
  0xe3   :  { %v160_v21 = vadd.f32 %v242_v14, %v148_v16  ;;  %v267_v22 = vpop.f32.mrb[3].mxu1 }
  0xe5   :  { %v161_v23 = vmax.f32 %v160_v21, 0.0 }
  0xe7   :  { %v163_v24 = vpack.c.bf16 %v161_v23, %v161_v23 }
  0xe9   :  { %269 = vmatpush3.bf16.xpose.msra.mxu0 %v163_v24 }
  0xf0   :  { %271 = vmatmul.mubr.bf16.vlgmr.msra.gmra.mrb[4].mxu0 %v162_v25 }
 0x1c3   :  { %v208_v31 = vpop.f32.mrb[4].mxu0 }
 0x1c4   :  { %v209_v32 = vadd.f32 %v208_v31, %v173_v30  ;;  %v272_v33 = vpop.f32.mrb[5].mxu0 }
 0x1c5   :  { %v211_v34 = vpop.f32.mrb[6].mxu0 }
 0x1c6   :  { %v243_v35 = vmul.f32 -1.442695, %v209_v32  ;;  %v273_v36 = vpop.f32.mrb[7].mxu0 }
 0x1c8   :  { %283 = vpow2.f32 %v243_v35 }
 0x1d2   :  { %v284_v37 = vpop.eup %283 }
 0x1d3   :  { %v217_v38 = vadd.f32 1.0, %v284_v37 }
 0x1d5   :  { %285 = vrcp.f32 %v217_v38 }
 0x1df   :  { %v286_v39 = vpop.eup %285 }
 0x1e0   :  { %221 = vst.msk [vmem:[#allocation3] sm:$0x1] %vm220_vm2, %v286_v39 }
 0x1e1   :  { %298 = shalt.err (!%p295_p4)
}
 0x1e2   :  { %s299_s18 = scalar_lea.hbm %s404_s7, 16 }
 0x1e3   :  { %p300_p5 = scmp.ne.s32.totalorder %s404_s7, %s299_s18  ;;  %p303_p6 = scmp.lt.u32.totalorder %s299_s18, %s404_s7 }
 0x1e5   :  { %p305_p7 = pnand %p303_p6, %p300_p5 }
 0x1e7   :  { %308 = shalt.err (!%p305_p7)
}
 0x1e8   :  { %231 = dma.vmem_to_hbm [thread:$0]  %s229_s14, 16, %s404_s7, [#allocation4]  }
 0x1e9   :  { %309 = dma.done.wait [#allocation4], 16  }
 0x1ea   :  { %310 = vsyncadd [#allocation4], 4294967280 }
 0x1eb   :  { %235 = vsyncpa [#allocation4], 1 }

</bundles_post_ra>
